<compile_context>
chip_gen: v7x
topology: tpu7x:2x2x1
jax: 0.10.0
libtpu: 0.0.40
codegen_flags: <defaults>
</compile_context>

<pallas_src>
import jax
import jax.numpy as jnp
from jax.experimental import pallas as pl
from jax.experimental.pallas import tpu as pltpu


def _decoder_kernel(z_ref, wt_ref, b_ref, xc_ref, probs_ref, nll_ref):
    z = z_ref[...]                                    # (tm, K)  f32
    wt = wt_ref[...]                                  # (K, N)   f32 (resident)
    b = b_ref[...]                                    # (1, N)   f32
    xc = xc_ref[...].astype(jnp.float32)              # (tm, N)  bf16 -> f32

    # Linear decoder model: z @ W^T + b   (MXU, f32 accumulation)
    y = jnp.dot(z, wt, preferred_element_type=jnp.float32) + b

    # probs_x = clamp(model(z), 0, 1)
    p = jnp.clip(y, 0.0, 1.0)
    probs_ref[...] = p.astype(probs_ref.dtype)

    # torch clamp_probs eps, then direct Bernoulli NLL on the clamped range
    # (mathematically identical to the logits/BCEWithLogits path).
    eps = jnp.float32(jnp.finfo(jnp.float32).eps)
    p_c = jnp.clip(p, eps, 1.0 - eps)
    nll = -(xc * jnp.log(p_c) + (1.0 - xc) * jnp.log1p(-p_c))
    nll_ref[...] = nll.astype(nll_ref.dtype)


def _round_up(v, m):
    return ((v + m - 1) // m) * m


def _choose_tm(M, K, N):
    """VMEM-aware row-tile: big enough to amortize per-step overhead, small
    enough to double-buffer within every generation's scoped-VMEM budget."""
    budget = 16 * 1024 * 1024                         # working-set target (bytes)
    resident = 2 * (K * N * 4 + N * 4)                # double-buffered W + bias
    per_row = 2 * (K * 4 + N * 2 + 2 * N * 4)         # 2x (z f32 + xc bf16 + 2 outs f32)
    tm = (budget - resident) // per_row
    tm = max(8, min(1024, (tm // 8) * 8))
    m_rounded = _round_up(max(M, 1), 8)
    tm = min(tm, m_rounded)
    # keep >= ~8 grid steps for pipelining (and v7x 2-TC sharding) when M allows
    steps_target = 8
    if m_rounded >= steps_target * 8:
        tm = min(tm, max(8, ((m_rounded // steps_target) // 8) * 8))
    return tm


def causal_bernoulli_decoder(z, x, W, b, *, n_t, n_t_out,
                             decode_current=False, tm=None):
    """z: (batch*n_x_keep, s_dim), x: (batch*n_t, x_dim), W: (x_dim, s_dim), b: (x_dim,)."""
    M, K = z.shape
    N = W.shape[0]
    n_x_keep = n_t_out + 1 if decode_current else n_t_out

    # glue: crop x along the time axis (pure reshape/slice, no compute).
    # binary values -> bf16 cast is lossless and halves this HBM stream.
    x_crop = x.reshape(-1, n_t, N)[:, -n_x_keep:].reshape(M, N).astype(jnp.bfloat16)

    z = z.astype(jnp.float32)
    wt = W.T.astype(jnp.float32)                      # (K, N) so kernel does z @ wt
    b2 = b.reshape(1, N).astype(jnp.float32)

    if tm is None:
        tm = _choose_tm(M, K, N)
    tm = max(8, (tm // 8) * 8)

    grid_m = pl.cdiv(M, tm)
    m_pad = grid_m * tm
    if m_pad != M:
        z = jnp.pad(z, ((0, m_pad - M), (0, 0)))
        x_crop = jnp.pad(x_crop, ((0, m_pad - M), (0, 0)))

    # TODO(synk): for very large x_dim (>~2-4K) add an N tile to the grid so the
    # resident (K, N) weight and (tm, N) blocks stay bounded on v7x's 64 MiB VMEM.
    probs, nll = pl.pallas_call(
        _decoder_kernel,
        out_shape=(jax.ShapeDtypeStruct((m_pad, N), jnp.float32),
                   jax.ShapeDtypeStruct((m_pad, N), jnp.float32)),
        grid_spec=pltpu.PrefetchScalarGridSpec(
            num_scalar_prefetch=0,
            grid=(grid_m,),
            in_specs=[
                pl.BlockSpec((tm, K), lambda i: (i, 0)),   # z rows tile
                pl.BlockSpec((K, N), lambda i: (0, 0)),    # full weight (resident)
                pl.BlockSpec((1, N), lambda i: (0, 0)),    # bias
                pl.BlockSpec((tm, N), lambda i: (i, 0)),   # x_crop rows tile (bf16)
            ],
            out_specs=[
                pl.BlockSpec((tm, N), lambda i: (i, 0)),   # probs_x
                pl.BlockSpec((tm, N), lambda i: (i, 0)),   # neg_logpx_z
            ],
        ),
        compiler_params=pltpu.CompilerParams(
            dimension_semantics=("parallel",),
            vmem_limit_bytes=32 * 1024 * 1024,
        ),
    )(z, wt, b2, x_crop)

    if m_pad != M:
        probs = probs[:M]
        nll = nll[:M]
    return probs, nll


def _reference(z, x, W, b, n_t, n_t_out):
    """Pure-JAX reference matching torch's Bernoulli(probs).log_prob path."""
    y = z @ W.T + b
    p = jnp.clip(y, 0.0, 1.0)
    N = W.shape[0]
    x_crop = x.reshape(-1, n_t, N)[:, -n_t_out:].reshape(p.shape).astype(jnp.float32)
    eps = jnp.finfo(jnp.float32).eps
    p_c = jnp.clip(p, eps, 1.0 - eps)
    logits = jnp.log(p_c) - jnp.log1p(-p_c)
    nll = (jnp.maximum(logits, 0.0) - logits * x_crop
           + jnp.log1p(jnp.exp(-jnp.abs(logits))))
    return p, nll


if __name__ == "__main__":
    key = jax.random.PRNGKey(0)
    kz, kx, kw, kb, kz2, kx2 = jax.random.split(key, 6)

    # --- small forward-consistent shapes ---
    batch, n_t, n_t_out = 2, 8, 4          # decode_current=False -> n_x_keep = 4
    s_dim, x_dim = 32, 256

    W = 0.05 * jax.random.normal(kw, (x_dim, s_dim), dtype=jnp.float32)
    b = 0.01 * jax.random.normal(kb, (x_dim,), dtype=jnp.float32)

    z = jax.random.normal(kz, (batch * n_t_out, s_dim), dtype=jnp.float32)
    x = jax.random.bernoulli(kx, p=0.5,
                             shape=(batch * n_t, x_dim)).astype(jnp.float32)

    probs, nll = causal_bernoulli_decoder(z, x, W, b, n_t=n_t, n_t_out=n_t_out)
    jax.block_until_ready((probs, nll))

    p_ref, nll_ref = _reference(z, x, W, b, n_t, n_t_out)
    assert jnp.allclose(probs, p_ref, atol=1e-5, rtol=1e-5)
    assert jnp.allclose(nll, nll_ref, atol=1e-4, rtol=1e-4)

    # --- second check: non-divisible M exercises cdiv grid + padding path ---
    batch2, n_t2, n_t_out2 = 3, 8, 5       # M = 15, forced tm=8 -> grid of 2, padded to 16
    z2 = jax.random.normal(kz2, (batch2 * n_t_out2, s_dim), dtype=jnp.float32)
    x2 = jax.random.bernoulli(kx2, p=0.5,
                              shape=(batch2 * n_t2, x_dim)).astype(jnp.float32)
    probs2, nll2 = causal_bernoulli_decoder(z2, x2, W, b,
                                            n_t=n_t2, n_t_out=n_t_out2, tm=8)
    jax.block_until_ready((probs2, nll2))
    p_ref2, nll_ref2 = _reference(z2, x2, W, b, n_t2, n_t_out2)
    assert probs2.shape == p_ref2.shape and nll2.shape == nll_ref2.shape
    assert jnp.allclose(probs2, p_ref2, atol=1e-5, rtol=1e-5)
    assert jnp.allclose(nll2, nll_ref2, atol=1e-4, rtol=1e-4)

    print("KERNEL_OK")
</pallas_src>

<mosaic_0001>
module attributes {stable_mosaic.version = 11 : i64} {
  func.func @_decoder_kernel(%arg0: i32, %arg1: memref<8x32xf32, #tpu.memory_space<vmem>>, %arg2: memref<32x256xf32, #tpu.memory_space<vmem>>, %arg3: memref<1x256xf32, #tpu.memory_space<vmem>>, %arg4: memref<8x256xbf16, #tpu.memory_space<vmem>>, %arg5: memref<8x256xf32, #tpu.memory_space<vmem>>, %arg6: memref<8x256xf32, #tpu.memory_space<vmem>>) attributes {dimension_semantics = [#tpu.dimension_semantics<parallel>], iteration_bounds = array<i64: 1>, scalar_prefetch = 0 : i64, scratch_operands = 0 : i64, tpu.core_type = #tpu.core_type<tc>, window_params = [{transform_indices = @transform_0, window_bounds = array<i64: 8, 32>}, {pipeline_mode = #tpu.pipeline_mode<synchronous>, transform_indices = @transform_1, window_bounds = array<i64: 32, 256>}, {pipeline_mode = #tpu.pipeline_mode<synchronous>, transform_indices = @transform_2, window_bounds = array<i64: 1, 256>}, {transform_indices = @transform_3, window_bounds = array<i64: 8, 256>}, {transform_indices = @transform_4, window_bounds = array<i64: 8, 256>}, {transform_indices = @transform_5, window_bounds = array<i64: 8, 256>}]} {
    %c0 = arith.constant 0 : index
    %c0_0 = arith.constant 0 : index
    %0 = vector.load %arg1[%c0, %c0_0] : memref<8x32xf32, #tpu.memory_space<vmem>>, vector<8x32xf32>
    %c0_1 = arith.constant 0 : index
    %c0_2 = arith.constant 0 : index
    %1 = vector.load %arg2[%c0_1, %c0_2] : memref<32x256xf32, #tpu.memory_space<vmem>>, vector<32x256xf32>
    %c0_3 = arith.constant 0 : index
    %c0_4 = arith.constant 0 : index
    %2 = vector.load %arg3[%c0_3, %c0_4] : memref<1x256xf32, #tpu.memory_space<vmem>>, vector<1x256xf32>
    %c0_5 = arith.constant 0 : index
    %c0_6 = arith.constant 0 : index
    %3 = vector.load %arg4[%c0_5, %c0_6] : memref<8x256xbf16, #tpu.memory_space<vmem>>, vector<8x256xbf16>
    %4 = arith.extf %3 : vector<8x256xbf16> to vector<8x256xf32>
    %cst = arith.constant dense<0.000000e+00> : vector<8x256xf32>
    %5 = tpu.matmul %0, %1, %cst {dimension_numbers = #tpu.dot_dimension_numbers<[1], [0], [0], [1], [0, 0, 1, 1], [], []>} : vector<8x32xf32>, vector<32x256xf32>, vector<8x256xf32> -> vector<8x256xf32>
    %6 = vector.broadcast %2 : vector<1x256xf32> to vector<8x256xf32>
    %7 = arith.addf %5, %6 : vector<8x256xf32>
    %cst_7 = arith.constant 0.000000e+00 : f32
    %cst_8 = arith.constant 1.000000e+00 : f32
    %8 = vector.broadcast %cst_7 : f32 to vector<8x256xf32>
    %9 = arith.maximumf %8, %7 : vector<8x256xf32>
    %10 = vector.broadcast %cst_8 : f32 to vector<8x256xf32>
    %11 = arith.minimumf %10, %9 : vector<8x256xf32>
    %c0_9 = arith.constant 0 : index
    %c0_10 = arith.constant 0 : index
    %12 = vector.load %arg5[%c0_9, %c0_10] : memref<8x256xf32, #tpu.memory_space<vmem>>, vector<8x256xf32>
    tpu.vector_store %arg5[%c0_9, %c0_10], %11 {strides = array<i32>} : memref<8x256xf32, #tpu.memory_space<vmem>>, vector<8x256xf32>,
    %cst_11 = arith.constant 1.000000e+00 : f32
    %cst_12 = arith.constant 1.1920929E-7 : f32
    %13 = arith.subf %cst_11, %cst_12 : f32
    %cst_13 = arith.constant 1.1920929E-7 : f32
    %14 = vector.broadcast %cst_13 : f32 to vector<8x256xf32>
    %15 = arith.maximumf %14, %11 : vector<8x256xf32>
    %16 = vector.broadcast %13 : f32 to vector<8x256xf32>
    %17 = arith.minimumf %16, %15 : vector<8x256xf32>
    %18 = math.log %17 : vector<8x256xf32>
    %19 = arith.mulf %4, %18 : vector<8x256xf32>
    %cst_14 = arith.constant 1.000000e+00 : f32
    %20 = vector.broadcast %cst_14 : f32 to vector<8x256xf32>
    %21 = arith.subf %20, %4 : vector<8x256xf32>
    %cst_15 = arith.constant 0.000000e+00 : f32
    %22 = vector.broadcast %cst_15 : f32 to vector<8x256xf32>
    %23 = arith.subf %22, %17 : vector<8x256xf32>
    %24 = math.log1p %23 : vector<8x256xf32>
    %25 = arith.mulf %21, %24 : vector<8x256xf32>
    %26 = arith.addf %19, %25 : vector<8x256xf32>
    %cst_16 = arith.constant 0.000000e+00 : f32
    %27 = vector.broadcast %cst_16 : f32 to vector<8x256xf32>
    %28 = arith.subf %27, %26 : vector<8x256xf32>
    %c0_17 = arith.constant 0 : index
    %c0_18 = arith.constant 0 : index
    %29 = vector.load %arg6[%c0_17, %c0_18] : memref<8x256xf32, #tpu.memory_space<vmem>>, vector<8x256xf32>
    tpu.vector_store %arg6[%c0_17, %c0_18], %28 {strides = array<i32>} : memref<8x256xf32, #tpu.memory_space<vmem>>, vector<8x256xf32>,
    return
  }
  func.func @transform_0(%arg0: i32) -> (i32, i32) {
    %c0_i32 = arith.constant 0 : i32
    %c0_i32_0 = arith.constant 0 : i32
    return %arg0, %c0_i32 : i32, i32
  }
  func.func @transform_1(%arg0: i32) -> (i32, i32) {
    %c0_i32 = arith.constant 0 : i32
    %c0_i32_0 = arith.constant 0 : i32
    %c0_i32_1 = arith.constant 0 : i32
    return %c0_i32, %c0_i32_0 : i32, i32
  }
  func.func @transform_2(%arg0: i32) -> (i32, i32) {
    %c0_i32 = arith.constant 0 : i32
    %c0_i32_0 = arith.constant 0 : i32
    %c0_i32_1 = arith.constant 0 : i32
    return %c0_i32, %c0_i32_0 : i32, i32
  }
  func.func @transform_3(%arg0: i32) -> (i32, i32) {
    %c0_i32 = arith.constant 0 : i32
    %c0_i32_0 = arith.constant 0 : i32
    return %arg0, %c0_i32 : i32, i32
  }
  func.func @transform_4(%arg0: i32) -> (i32, i32) {
    %c0_i32 = arith.constant 0 : i32
    %c0_i32_0 = arith.constant 0 : i32
    return %arg0, %c0_i32 : i32, i32
  }
  func.func @transform_5(%arg0: i32) -> (i32, i32) {
    %c0_i32 = arith.constant 0 : i32
    %c0_i32_0 = arith.constant 0 : i32
    return %arg0, %c0_i32 : i32, i32
  }
}

</mosaic_0001>

<bundles_post_ra>
// kernel: tpu_custom_call.1
= control target key start
LH: loop header
LB: loop body
LE: loop exit
PB: predicated region body
PF: predicated region fallthrough
CT: control target
= control target key end

     0   :  { %11 = vsyncpa [#allocation3], 0  ;;  %s440_s0 = inlined_call_operand.hbm [shape: f32[8,32], index: 0, kind: input, shape index: {}]   ;;  %s441_s1 = inlined_call_operand.hbm [shape: f32[32,256], index: 1, kind: input, shape index: {}]   ;;  %s442_s2 = inlined_call_operand.vmem [shape: f32[1,256], index: 2, kind: input, shape index: {}]   ;;  %s443_s3 = inlined_call_operand.vmem [shape: bf16[8,256], index: 3, kind: input, shape index: {}]   ;;  %s444_s4 = inlined_call_operand.hbm [shape: f32[8,256], index: 4, kind: output, shape index: {0}]   ;;  %s445_s5 = inlined_call_operand.hbm [shape: f32[8,256], index: 5, kind: output, shape index: {1}]  }
   0x1   :  { %12 = vsyncpa [#allocation6], 0 }
   0x2   :  { %13 = vsyncpa [#allocation4], 0 }
   0x3   :  { %14 = vsyncpa [#allocation9], 0  ;;  %s342_s18 = smov [#allocation2]   ;;  %s343_s20 = smov [#allocation5]  }
   0x4   :  { %s21_s19 = sshll.u32 %s342_s18, 4  ;;  %s30_s21 = sshll.u32 %s343_s20, 4  ;;  %s22_s19 = int_to_ptr.vmem [resolvable:$true] %s21_s19  ;;  %s379_s21 = int_to_ptr.vmem [resolvable:$true] %s30_s21 }
   0x5   :  { %s246_s24 = scalar_lea.hbm %s440_s0, 128 }
   0x6   :  { %p247_p0 = scmp.ne.s32.totalorder %s440_s0, %s246_s24  ;;  %p250_p1 = scmp.lt.u32.totalorder %s246_s24, %s440_s0 }
   0x8   :  { %p252_p2 = pnand %p250_p1, %p247_p0 }
   0xa   :  { %255 = shalt.err (!%p252_p2)
}
   0xb   :  { %s256_s29 = scalar_lea.vmem %s22_s19, 128  ;;  %p261_p4 = scmp.lt.s32.totalorder %s22_s19, %s22_s19 }
   0xc   :  { %p257_p3 = scmp.ne.s32.totalorder %s22_s19, %s256_s29  ;;  %p262_p5 = scmp.lt.s32.totalorder %s256_s29, %s256_s29 }
   0xe   :  { %p263_p6 = por %p262_p5, %p261_p4 }
  0x10   :  { %p264_p7 = pnand %p263_p6, %p257_p3 }
  0x12   :  { %267 = shalt.err (!%p264_p7)
}
  0x13   :  { %24 = dma.hbm_to_vmem [thread:$0]  %s440_s0, 128, %s22_s19, [#allocation3]  }
  0x14   :  { %s268_s9 = scalar_lea.hbm %s441_s1, 1024 }
  0x15   :  { %p269_p8 = scmp.ne.s32.totalorder %s441_s1, %s268_s9  ;;  %p272_p9 = scmp.lt.u32.totalorder %s268_s9, %s441_s1 }
  0x17   :  { %p274_p10 = pnand %p272_p9, %p269_p8 }
  0x19   :  { %277 = shalt.err (!%p274_p10)
}
  0x1a   :  { %s278_s14 = scalar_lea.vmem %s379_s21, 1024  ;;  %p283_p12 = scmp.lt.s32.totalorder %s379_s21, %s379_s21 }
  0x1b   :  { %p279_p11 = scmp.ne.s32.totalorder %s379_s21, %s278_s14  ;;  %p284_p13 = scmp.lt.s32.totalorder %s278_s14, %s278_s14 }
  0x1d   :  { %p285_p0 = por %p284_p13, %p283_p12 }
  0x1f   :  { %p286_p1 = pnand %p285_p0, %p279_p11 }
  0x21   :  { %289 = shalt.err (!%p286_p1)
}
  0x22   :  { %s344_s0 = smov 256   ;;  %s345_s15 = smov 16  }
  0x23   :  { %36 = dma.hbm_to_vmem [thread:$0]  %s441_s1, 1024, %s379_s21, [#allocation6], %s344_s0, %s344_s0, %s345_s15  }
  0x24   :  { %334 = dma.done.wait [#allocation3], 128  }
  0x25   :  { %335 = vsyncadd [#allocation3], 4294967168 }
  0x26   :  { %336 = dma.done.wait [#allocation6], 1024  }
  0x27   :  { %337 = vsyncadd [#allocation6], 4294966272  ;;  %v346_v0 = vmov 0.0   ;;  %v49_v1 = vld [vmem:[#allocation5 + $0x8] sm:$0xff]  ;;  %v51_v2 = vld [vmem:[#allocation5 + $0x18] sm:$0xff]  ;;  %vm71_vm0 = vcmask 261120   ;;  %v61_v14 = vlaneseq }
  0x28   :  { %139 = vmatprep.mubr.f32.mxu0 %v346_v0  ;;  %v48_v3 = vld [vmem:[#allocation5] sm:$0xff]  ;;  %v223_v4 = vpack.c.bf16 %v51_v2, %v49_v1  ;;  %v50_v5 = vld [vmem:[#allocation5 + $0x10] sm:$0xff]  ;;  %v53_v6 = vld [vmem:[#allocation5 + $0x28] sm:$0xff]  ;;  %s347_s19 = smov [#allocation7]  }
  0x29   :  { %v55_v7 = vld [vmem:[#allocation5 + $0x38] sm:$0xff]  ;;  %v225_v8 = vpack.c.bf16 %v50_v5, %v48_v3  ;;  %v52_v10 = vld [vmem:[#allocation5 + $0x20] sm:$0xff]  ;;  %v54_v11 = vld [vmem:[#allocation5 + $0x30] sm:$0xff]  ;;  %v62_v15 = vshrl.u32 %v61_v14, 7  ;;  %s198_s20 = sshll.u32 %s347_s19, 4  ;;  %s199_s20 = int_to_ptr.vmem [resolvable:$true] %s198_s20 }
  0x2a   :  { %v227_v9 = vpack.c.bf16 %v55_v7, %v53_v6  ;;  %224 = vmatprep.subr.bf16.mxu0 %v223_v4  ;;  %v229_v12 = vpack.c.bf16 %v54_v11, %v52_v10  ;;  %v47_v13 = vld [vmem:[#allocation2] sm:$0xff]  ;;  %p295_p3 = scmp.lt.s32.totalorder %s199_s20, %s199_s20 }
  0x2b   :  { %226 = vmatpush1.bf16.msra.mxu0 %v225_v8  ;;  %v63_v16 = vsub.s32 0, %v62_v15  ;;  %v56_v17 = vld [vmem:[%s442_s2] sm:$0x3]  ;;  %v67_v18 = vsub.s32 1, %v62_v15  ;;  %s290_s2 = scalar_lea.vmem %s199_s20, 256 }
  0x2c   :  { %228 = vmatprep.subr.bf16.mxu0 %v227_v9  ;;  %p291_p2 = scmp.ne.s32.totalorder %s199_s20, %s290_s2  ;;  %p296_p4 = scmp.lt.s32.totalorder %s290_s2, %s290_s2 }
  0x2d   :  { %v64_v19 = vrot.slane %v56_v17, %v63_v16  ;;  %v68_v20 = vrot.slane %v56_v17, %v67_v18 }
  0x2e   :  { %p297_p5 = por %p296_p4, %p295_p3 }
  0x2f   :  { %230 = vmatpush1.bf16.msra.mxu0 %v229_v12 }
  0x30   :  { %p298_p6 = pnand %p297_p5, %p291_p2 }
  0x32   :  { %222 = vmatmul.mubr.msk.f32.vlgmr.msra.gmra.mrb[0].mxu0 %vm71_vm0, %v47_v13 }
 0x105   :  { %v141_v21 = vpop.f32.mrb[0].mxu0 }
 0x106   :  { %v142_v22 = vadd.f32 %v141_v21, %v64_v19  ;;  %v143_v23 = vpop.f32.mrb[1].mxu0 }
 0x107   :  { %v144_v24 = vadd.f32 %v143_v23, %v68_v20 }
 0x108   :  { %v146_v25 = vmax.f32 %v142_v22, 0.0 }
 0x109   :  { %v147_v26 = vmax.f32 %v144_v24, 0.0 }
 0x10a   :  { %v148_v27 = vmin.f32 %v146_v25, 1.0 }
 0x10b   :  { %v149_v28 = vmin.f32 %v147_v26, 1.0 }
 0x10c   :  { %v152_v29 = vmax.f32 %v148_v27, 1.1920929e-07  ;;  %150 = vst [vmem:[#allocation7] sm:$0xff] %v148_v27 }
 0x10d   :  { %v153_v30 = vmax.f32 %v149_v28, 1.1920929e-07  ;;  %151 = vst [vmem:[#allocation7 + $0x8] sm:$0xff] %v149_v28 }
 0x10e   :  { %v154_v31 = vmin.f32 %v152_v29, 0.9999999 }
 0x10f   :  { %301 = shalt.err (!%p298_p6)
}
 0x110   :  { %s302_s23 = scalar_lea.hbm %s444_s4, 256 }
 0x111   :  { %p303_p7 = scmp.ne.s32.totalorder %s444_s4, %s302_s23  ;;  %p306_p8 = scmp.lt.u32.totalorder %s302_s23, %s444_s4 }
 0x113   :  { %p308_p9 = pnand %p306_p8, %p303_p7 }
 0x115   :  { %311 = shalt.err (!%p308_p9)
}
 0x116   :  { %201 = dma.vmem_to_hbm [thread:$0]  %s199_s20, 256, %s444_s4, [#allocation4]   ;;  %v155_v32 = vmin.f32 %v153_v30, 0.9999999  ;;  %v164_v33 = vsub.f32 0.0, %v154_v31  ;;  %238 = vlog2.f32 %v154_v31  ;;  %v57_v39 = vld [vmem:[%s443_s3] sm:$0xff] }
 0x117   :  { %v58_v44 = vunpack.c.l.bf16 %v57_v39  ;;  %v59_v46 = vunpack.c.h.bf16 %v57_v39  ;;  %s348_s3 = smov [#allocation8]  }
 0x118   :  { %v165_v34 = vsub.f32 0.0, %v155_v32  ;;  %v166_v35 = vadd.f32 1.0, %v164_v33  ;;  %240 = vlog2.f32 %v155_v32  ;;  %v169_v37 = vmul.f32 -0.5, %v164_v33  ;;  %s208_s4 = sshll.u32 %s348_s3, 4  ;;  %s209_s4 = int_to_ptr.vmem [resolvable:$true] %s208_s4 }
 0x119   :  { %v172_v45 = vand.u32 2147483647, %v164_v33  ;;  %v162_v50 = vsub.f32 1.0, %v58_v44  ;;  %v163_v53 = vsub.f32 1.0, %v59_v46  ;;  %s312_s7 = scalar_lea.vmem %s209_s4, 256  ;;  %p317_p11 = scmp.lt.s32.totalorder %s209_s4, %s209_s4 }
 0x11a   :  { %v175_v36 = vadd.f32 1.0, %v165_v34  ;;  %242 = vlog2.f32 %v166_v35  ;;  %v178_v38 = vmul.f32 -0.5, %v165_v34  ;;  %v170_v41 = vadd.f32 1.0, %v169_v37  ;;  %p313_p10 = scmp.ne.s32.totalorder %s209_s4, %s312_s7  ;;  %p318_p12 = scmp.lt.s32.totalorder %s312_s7, %s312_s7 }
 0x11b   :  { %v181_v47 = vand.u32 2147483647, %v165_v34  ;;  %vm173_vm1 = vcmp.lt.f32.partialorder %v172_v45, 0.0004427343 }
 0x11c   :  { %244 = vlog2.f32 %v175_v36  ;;  %v179_v43 = vadd.f32 1.0, %v178_v38  ;;  %v171_v55 = vmul.f32 %v170_v41, %v164_v33  ;;  %p319_p13 = por %p318_p12, %p317_p11 }
 0x11d   :  { %vm182_vm2 = vcmp.lt.f32.partialorder %v181_v47, 0.0004427343 }
 0x11e   :  { %v180_v57 = vmul.f32 %v179_v43, %v165_v34  ;;  %p320_p0 = pnand %p319_p13, %p313_p10 }
 0x120   :  { %v239_v40 = vpop.eup %238 }
 0x121   :  { %v157_v49 = vmul.f32 0.6931472, %v239_v40 }
 0x122   :  { %v241_v42 = vpop.eup %240 }
 0x123   :  { %v159_v52 = vmul.f32 0.6931472, %v241_v42  ;;  %v160_v59 = vmul.f32 %v157_v49, %v58_v44 }
 0x124   :  { %v243_v48 = vpop.eup %242 }
 0x125   :  { %v168_v54 = vmul.f32 0.6931472, %v243_v48  ;;  %v161_v62 = vmul.f32 %v159_v52, %v59_v46 }
 0x126   :  { %v245_v51 = vpop.eup %244 }
 0x127   :  { %v177_v56 = vmul.f32 0.6931472, %v245_v51  ;;  %v174_v58 = vsel %vm173_vm1, %v171_v55, %v168_v54 }
 0x128   :  { %v184_v61 = vmul.f32 %v174_v58, %v162_v50 }
 0x129   :  { %v183_v60 = vsel %vm182_vm2, %v180_v57, %v177_v56 }
 0x12a   :  { %v185_v63 = vmul.f32 %v183_v60, %v163_v53  ;;  %v186_v0 = vadd.f32 %v184_v61, %v160_v59 }
 0x12c   :  { %v187_v1 = vadd.f32 %v185_v63, %v161_v62  ;;  %v188_v2 = vsub.f32 0.0, %v186_v0 }
 0x12e   :  { %v189_v3 = vsub.f32 0.0, %v187_v1  ;;  %190 = vst [vmem:[#allocation8] sm:$0xff] %v188_v2 }
 0x130   :  { %191 = vst [vmem:[#allocation8 + $0x8] sm:$0xff] %v189_v3 }
 0x131   :  { %323 = shalt.err (!%p320_p0)
}
 0x132   :  { %s324_s10 = scalar_lea.hbm %s445_s5, 256 }
 0x133   :  { %p325_p1 = scmp.ne.s32.totalorder %s445_s5, %s324_s10  ;;  %p328_p2 = scmp.lt.u32.totalorder %s324_s10, %s445_s5 }
 0x135   :  { %p330_p3 = pnand %p328_p2, %p325_p1 }
 0x137   :  { %333 = shalt.err (!%p330_p3)
}
 0x138   :  { %211 = dma.vmem_to_hbm [thread:$0]  %s209_s4, 256, %s445_s5, [#allocation9]  }
 0x139   :  { %338 = dma.done.wait [#allocation4], 256  }
 0x13a   :  { %339 = vsyncadd [#allocation4], 4294967040 }
 0x13b   :  { %340 = dma.done.wait [#allocation9], 256  }
 0x13c   :  { %341 = vsyncadd [#allocation9], 4294967040 }
 0x13d   :  { %218 = vsyncpa [#allocation3], 1 }
 0x13e   :  { %219 = vsyncpa [#allocation6], 1 }
 0x13f   :  { %220 = vsyncpa [#allocation4], 1 }
 0x140   :  { %221 = vsyncpa [#allocation9], 1 }

</bundles_post_ra>
